<compile_context>
chip_gen: v7x
topology: tpu7x:2x2x1
jax: 0.10.0
libtpu: 0.0.40
codegen_flags: <defaults>
</compile_context>

<pallas_src>
import jax
import jax.numpy as jnp
from jax.experimental import pallas as pl
from jax.experimental.pallas import tpu as pltpu


def _round_up(x, m):
    return ((x + m - 1) // m) * m


_VMEM_BUDGET = 24 * 1024 * 1024  # leave headroom inside the 32 MiB scoped VMEM limit


# ------------------------- Pallas kernel (hot path) -------------------------
def _proj_kernel(x_ref, w_ref, b_ref, o_ref):
    # x_ref: [tm, K] bf16 patches, w_ref: [K, tn] bf16 (grid-resident), b_ref: [1, tn] f32
    acc = jnp.dot(x_ref[...], w_ref[...], preferred_element_type=jnp.float32)
    o_ref[...] = (acc + b_ref[...]).astype(o_ref.dtype)


def _pick_tm(M, block_m, per_row_bytes, fixed_bytes):
    """M tile: multiple of 16 (bf16 sublane packing), fits VMEM budget, >=2 tiles if possible."""
    if block_m is not None:
        tm = max(16, _round_up(block_m, 16))
    else:
        # default 512, but keep at least two M-tiles so both v7x TensorCores get work
        tm = min(512, max(16, _round_up(pl.cdiv(M, 2), 16)))
    while tm > 16 and fixed_bytes + tm * per_row_bytes > _VMEM_BUDGET:
        tm = max(16, _round_up(tm // 2, 16))
    return M if tm >= M else tm   # a full-extent block is always a legal block shape


def _patch_project(patches, w_ke, bias2d, *, out_dtype, block_m=None):
    """patches [M, K] bf16 @ w_ke [K, E_pad] bf16 + bias2d [1, E_pad] f32 -> [M, E_pad]."""
    M, K = patches.shape
    Kw, E_pad = w_ke.shape
    assert K == Kw, (K, Kw)
    lhs_b = patches.dtype.itemsize
    out_b = jnp.dtype(out_dtype).itemsize
    w_b = w_ke.dtype.itemsize

    weight_resident = K * E_pad * w_b <= _VMEM_BUDGET // 2

    if weight_resident:
        # 1-D grid over M; weight/bias block indices are constant -> DMA'd once, reused
        # by every grid step.  Only the patch and output streams are pipelined.
        fixed = K * E_pad * w_b + 2 * E_pad * 4
        tm = _pick_tm(M, block_m, 2 * (K * lhs_b + E_pad * out_b), fixed)
        tn = E_pad
        grid = (pl.cdiv(M, tm),)
        in_specs = [
            pl.BlockSpec((tm, K), lambda i: (i, 0)),      # patches stream (double-buffered)
            pl.BlockSpec((K, E_pad), lambda i: (0, 0)),   # resident weight (single DMA)
            pl.BlockSpec((1, E_pad), lambda i: (0, 0)),   # resident bias
        ]
        out_specs = pl.BlockSpec((tm, E_pad), lambda i: (i, 0))
        semantics = ("parallel",)
    else:
        # Fallback for very large K*E_pad: tile the embed dim too (weight is re-streamed).
        tn = 256 if E_pad % 256 == 0 else 128
        fixed = 2 * K * tn * w_b + 2 * tn * 4
        tm = _pick_tm(M, block_m, 2 * (K * lhs_b + tn * out_b), fixed)
        grid = (pl.cdiv(M, tm), pl.cdiv(E_pad, tn))
        in_specs = [
            pl.BlockSpec((tm, K), lambda i, j: (i, 0)),
            pl.BlockSpec((K, tn), lambda i, j: (0, j)),
            pl.BlockSpec((1, tn), lambda i, j: (0, j)),
        ]
        out_specs = pl.BlockSpec((tm, tn), lambda i, j: (i, j))
        semantics = ("parallel", "parallel")

    n_weight_reads = 1 if weight_resident else pl.cdiv(M, tm)
    cost = pl.CostEstimate(
        flops=2 * M * K * E_pad,
        transcendentals=0,
        bytes_accessed=(M * K * lhs_b
                        + n_weight_reads * K * E_pad * w_b
                        + E_pad * 4
                        + M * E_pad * out_b),
    )

    return pl.pallas_call(
        _proj_kernel,
        out_shape=jax.ShapeDtypeStruct((M, E_pad), out_dtype),
        grid_spec=pltpu.PrefetchScalarGridSpec(
            num_scalar_prefetch=0,
            grid=grid,
            in_specs=in_specs,
            out_specs=out_specs,
        ),
        compiler_params=pltpu.CompilerParams(
            dimension_semantics=semantics,
            vmem_limit_bytes=32 * 1024 * 1024,   # safe on v5e/v6e/v7x
        ),
        cost_estimate=cost,
    )(patches, w_ke, bias2d)


# ------------------------------ module wrapper ------------------------------
class PatchEmbedPallas:
    """2D Image to Patch Embedding (Conv2d with stride == kernel_size) on TPU Pallas."""

    def __init__(self, img_size=16, patch_size=4, stride=4, in_chans=4, embed_dim=32,
                 flatten=True, key=None, block_m=None, out_dtype=jnp.bfloat16):
        to2 = lambda v: (v, v) if isinstance(v, int) else tuple(v)
        self.img_size = to2(img_size)
        self.patch_size = to2(patch_size)
        self.stride = to2(stride)
        assert self.stride == self.patch_size, "kernel supports stride == patch_size"
        assert self.img_size[0] % self.patch_size[0] == 0
        assert self.img_size[1] % self.patch_size[1] == 0
        self.grid_size = (self.img_size[0] // self.stride[0],
                          self.img_size[1] // self.stride[1])
        self.num_patches = self.grid_size[0] * self.grid_size[1]
        self.flatten = flatten
        self.embed_dim = embed_dim
        self.in_chans = in_chans
        self.block_m = block_m
        self.out_dtype = out_dtype   # bf16 store by default (f32 accumulate inside)

        # Deterministic parameter init (Conv2d weight [E, C, ph, pw], bias [E]).
        key = jax.random.PRNGKey(0) if key is None else key
        kw, kb = jax.random.split(key)
        ph, pw = self.patch_size
        fan_in = in_chans * ph * pw
        bound = 1.0 / (fan_in ** 0.5)
        self.weight = jax.random.uniform(
            kw, (embed_dim, in_chans, ph, pw), jnp.float32, -bound, bound)
        self.bias = jax.random.uniform(
            kb, (embed_dim,), jnp.float32, -bound, bound)

        # ---- hoisted, kernel-ready parameter layouts (done once) ----
        self.K = fan_in
        # Pad K to 128 for small-patch configs (lane-dense LHS, better MXU fill);
        # PaSST's default K=256 is already a multiple of 128.
        self.K_pad = 128 if fan_in < 128 else fan_in
        self.embed_dim_pad = _round_up(embed_dim, 128)        # lane-dense output stores
        # Conv weight [E, C, ph, pw] -> K-order (kh, kw, c) -> [K, E], matching the
        # (ph, pw, C) flatten order of the NHWC patch extraction.
        w_ke = jnp.transpose(self.weight, (2, 3, 1, 0)).reshape(self.K, embed_dim)
        w_ke = jnp.pad(w_ke, ((0, self.K_pad - self.K),
                              (0, self.embed_dim_pad - embed_dim)))
        bias_p = jnp.pad(self.bias, (0, self.embed_dim_pad - embed_dim))
        self.w_ke = w_ke.astype(jnp.bfloat16)                 # resident bf16 MXU operand
        self.bias2d = bias_p.reshape(1, self.embed_dim_pad).astype(jnp.float32)

        self._forward_jit = jax.jit(self._forward)

    def _extract_patches(self, x):
        B, C, H, W = x.shape
        ph, pw = self.patch_size
        GH, GW = self.grid_size
        # NCHW -> NHWC (a pure reshape when C == 1, PaSST's spectrogram case), one
        # middle-axes swap, K zero-pad and bf16 cast.  Under jit this chain fuses into
        # a single XLA copy producing the bf16 im2col matrix directly from the image.
        x = jnp.transpose(x, (0, 2, 3, 1))                    # [B, H, W, C]
        x = x.reshape(B, GH, ph, GW, pw * C)                  # pure reshape
        x = jnp.transpose(x, (0, 1, 3, 2, 4))                 # [B, GH, GW, ph, pw*C]
        x = x.reshape(B * GH * GW, ph * pw * C)               # [M, K]
        if self.K_pad != self.K:
            x = jnp.pad(x, ((0, 0), (0, self.K_pad - self.K)))
        # TODO(synk): fold this gather into the kernel (per-tile DMA from the NHWC
        # image + in-VMEM ph<->GW swap) to remove the remaining im2col HBM round trip.
        return x.astype(jnp.bfloat16)

    def _forward(self, x):
        # x: [B, C, H, W]  (NCHW, same as the PyTorch module)
        B, C, H, W = x.shape
        GH, GW = self.grid_size
        E, Ep = self.embed_dim, self.embed_dim_pad

        patches = self._extract_patches(x)                    # [M, K_pad] bf16

        out = _patch_project(patches, self.w_ke, self.bias2d,
                             out_dtype=self.out_dtype,
                             block_m=self.block_m)            # [M, Ep] out_dtype
        if Ep != E:
            # TODO(synk): only needed when embed_dim % 128 != 0; PaSST's 768 avoids it.
            out = out[:, :E]

        out = out.reshape(B, GH * GW, E)                      # == flatten(2).transpose(1, 2)
        if not self.flatten:
            out = jnp.transpose(out.reshape(B, GH, GW, E), (0, 3, 1, 2))
        # self.norm is nn.Identity() (norm_layer=None default) -> no-op
        return out

    def __call__(self, x):
        return self._forward_jit(x)


# ----------------------------------- main -----------------------------------
if __name__ == "__main__":
    key = jax.random.PRNGKey(0)
    kx, kp = jax.random.split(key)

    B, C, H, W = 2, 4, 16, 16
    x = jax.random.normal(kx, (B, C, H, W), jnp.float32)

    # block_m=16 so the toy shapes exercise a real multi-tile grid (2 M-tiles).
    mod = PatchEmbedPallas(img_size=16, patch_size=4, stride=4,
                           in_chans=C, embed_dim=32, key=kp, block_m=16)

    out = jax.block_until_ready(mod(x))
    assert out.shape == (B, mod.num_patches, mod.embed_dim), out.shape
    out_f32 = out.astype(jnp.float32)

    # Tight check: same bf16 im2col @ bf16 weight (f32 accumulate, f32 bias, narrow
    # store) in plain JAX.
    patches = mod._extract_patches(x)
    ref_mm = jnp.dot(patches, mod.w_ke, preferred_element_type=jnp.float32) + mod.bias2d
    ref_mm = ref_mm[:, :mod.embed_dim].astype(mod.out_dtype).astype(jnp.float32)
    ref_mm = ref_mm.reshape(B, mod.num_patches, mod.embed_dim)
    assert jnp.allclose(out_f32, ref_mm, atol=1e-2, rtol=1e-2)

    # Semantic check vs. float32 Conv2d (stride == kernel); tolerance covers the
    # intentional bf16 cast of the matmul operands and of the output store.
    ref = jax.lax.conv_general_dilated(
        x, mod.weight, window_strides=mod.stride, padding="VALID",
        dimension_numbers=("NCHW", "OIHW", "NCHW"))
    ref = ref + mod.bias.reshape(1, -1, 1, 1)
    ref = jnp.transpose(ref.reshape(B, mod.embed_dim, -1), (0, 2, 1))
    assert jnp.allclose(out_f32, ref, atol=3e-2, rtol=3e-2)

    print("KERNEL_OK")
</pallas_src>

<mosaic_0001>
module attributes {stable_mosaic.version = 11 : i64} {
  func.func @_proj_kernel(%arg0: i32, %arg1: memref<16x128xbf16, #tpu.memory_space<vmem>>, %arg2: memref<128x128xbf16, #tpu.memory_space<vmem>>, %arg3: memref<1x128xf32, #tpu.memory_space<vmem>>, %arg4: memref<16x128xbf16, #tpu.memory_space<vmem>>) attributes {dimension_semantics = [#tpu.dimension_semantics<parallel>], iteration_bounds = array<i64: 2>, scalar_prefetch = 0 : i64, scratch_operands = 0 : i64, tpu.core_type = #tpu.core_type<tc>, window_params = [{transform_indices = @transform_0, window_bounds = array<i64: 16, 128>}, {pipeline_mode = #tpu.pipeline_mode<synchronous>, transform_indices = @transform_1, window_bounds = array<i64: 128, 128>}, {pipeline_mode = #tpu.pipeline_mode<synchronous>, transform_indices = @transform_2, window_bounds = array<i64: 1, 128>}, {transform_indices = @transform_3, window_bounds = array<i64: 16, 128>}]} {
    %c0 = arith.constant 0 : index
    %c0_0 = arith.constant 0 : index
    %0 = vector.load %arg1[%c0, %c0_0] : memref<16x128xbf16, #tpu.memory_space<vmem>>, vector<16x128xbf16>
    %c0_1 = arith.constant 0 : index
    %c0_2 = arith.constant 0 : index
    %1 = vector.load %arg2[%c0_1, %c0_2] : memref<128x128xbf16, #tpu.memory_space<vmem>>, vector<128x128xbf16>
    %cst = arith.constant dense<0.000000e+00> : vector<16x128xf32>
    %2 = tpu.matmul %0, %1, %cst {dimension_numbers = #tpu.dot_dimension_numbers<[1], [0], [0], [1], [0, 0, 1, 1], [], []>} : vector<16x128xbf16>, vector<128x128xbf16>, vector<16x128xf32> -> vector<16x128xf32>
    %c0_3 = arith.constant 0 : index
    %c0_4 = arith.constant 0 : index
    %3 = vector.load %arg3[%c0_3, %c0_4] : memref<1x128xf32, #tpu.memory_space<vmem>>, vector<1x128xf32>
    %4 = vector.broadcast %3 : vector<1x128xf32> to vector<16x128xf32>
    %5 = arith.addf %2, %4 : vector<16x128xf32>
    %6 = arith.truncf %5 : vector<16x128xf32> to vector<16x128xbf16>
    %c0_5 = arith.constant 0 : index
    %c0_6 = arith.constant 0 : index
    %7 = vector.load %arg4[%c0_5, %c0_6] : memref<16x128xbf16, #tpu.memory_space<vmem>>, vector<16x128xbf16>
    tpu.vector_store %arg4[%c0_5, %c0_6], %6 {strides = array<i32>} : memref<16x128xbf16, #tpu.memory_space<vmem>>, vector<16x128xbf16>,
    return
  }
  func.func @transform_0(%arg0: i32) -> (i32, i32) {
    %c0_i32 = arith.constant 0 : i32
    %c0_i32_0 = arith.constant 0 : i32
    return %arg0, %c0_i32 : i32, i32
  }
  func.func @transform_1(%arg0: i32) -> (i32, i32) {
    %c0_i32 = arith.constant 0 : i32
    %c0_i32_0 = arith.constant 0 : i32
    %c0_i32_1 = arith.constant 0 : i32
    return %c0_i32, %c0_i32_0 : i32, i32
  }
  func.func @transform_2(%arg0: i32) -> (i32, i32) {
    %c0_i32 = arith.constant 0 : i32
    %c0_i32_0 = arith.constant 0 : i32
    %c0_i32_1 = arith.constant 0 : i32
    return %c0_i32, %c0_i32_0 : i32, i32
  }
  func.func @transform_3(%arg0: i32) -> (i32, i32) {
    %c0_i32 = arith.constant 0 : i32
    %c0_i32_0 = arith.constant 0 : i32
    return %arg0, %c0_i32 : i32, i32
  }
}

</mosaic_0001>

<bundles_post_ra>
// kernel: _forward.1
= control target key start
LH: loop header
LB: loop body
LE: loop exit
PB: predicated region body
PF: predicated region fallthrough
CT: control target
= control target key end

     0   :  { %8 = vsyncpa [#allocation3], 0  ;;  %s710_s0 = inlined_call_operand.vmem [shape: bf16[32,128], index: 0, kind: input, shape index: {}]   ;;  %s711_s1 = inlined_call_operand.vmem [shape: bf16[128,128], index: 1, kind: input, shape index: {}]   ;;  %s712_s2 = inlined_call_operand.vmem [shape: f32[1,128], index: 2, kind: input, shape index: {}]   ;;  %s713_s3 = inlined_call_operand.hbm [shape: bf16[32,128], index: 3, kind: output, shape index: {}]  }
   0x1   :  { %10 = vsyncpa [#allocation3 + $0x1], 0  ;;  %s581_s12 = smov 0   ;;  %s583_s13 = smov 0  }
   0x2   :  { %s585_s14 = smov 0   ;;  %s587_s15 = smov 0  }
   0x3 LB: > { %s602_s16 = sadd.s32 4294967295, %s554_s15   ;;  %s379_s17 = sadd.s32 4294967294, %s554_s15   ;;  %s554_s15 = sphi %s587_s15, %s719_s15   ;;  %s550_s14 = sphi %s585_s14, %s718_s14   ;;  %s546_s13 = sphi %s583_s13, %s717_s13   ;;  %s542_s12 = sphi %s581_s12, %s716_s12  }
   0x4   : > { %s606_s18 = sadd.s32 1, %s554_s15   ;;  %s91_s19 = sadd.s32 1, %s550_s14 }
   0x5   : > { %s88_s20 = ssub.s32 %s554_s15, %s606_s18  ;;  %p101_p0 = scmp.ne.s32.totalorder %s550_s14, %s546_s13 }
   0x6   : > { %p89_p1 = scmp.eq.s32.totalorder %s88_s20, 0  ;;  %p102_p2 = scmp.eq.s32.totalorder %s602_s16, 1 }
   0x7   : > { %p107_p3 = scmp.ne.s32.totalorder %s546_s13, %s542_s12  ;;  %p108_p4 = scmp.eq.s32.totalorder %s379_s17, 1 }
   0x8   : > { %s617_s21 = scalar_select %p89_p1, %s550_s14, %s91_s19  }
   0x9   : > { %p619_p5 = por %p102_p2, %p101_p0  ;;  %p623_p6 = por %p108_p4, %p107_p3 }
   0xa   : > { %p382_p7 = scmp.ge.s32.totalorder %s554_s15, 1  ;;  %p141_p8 = scmp.lt.s32.totalorder %s554_s15, 3 }
   0xc   : > { %p142_p9 = pnand %p382_p7, %p141_p8 }
   0xd   : > { %v483_v0 = vld [vmem:[%s711_s1] sm:$0xff] (!%p142_p9)   ;;  %v556_v1 = vmov (!%p142_p9), 0.0   ;;  %v484_v2 = vld [vmem:[%s711_s1 + $0x8] sm:$0xff] (!%p142_p9)   ;;  %vm557_vm0 = vmmov (!%p142_p9), 0   ;;  %s384_s28 = sshll.u32 (!%p142_p9), %s602_s16, 1  ;;  %v485_v3 = vld [vmem:[%s711_s1 + $0x10] sm:$0xff] (!%p142_p9)  }
   0xe   : > { %145 = sbr.rel (%p142_p9) target bundleno = 279 (0x117), region = 32  ;;  %420 = vmatprep.subr.bf16.mxu0 (!%p142_p9), %v556_v1  ;;  %436 = vmatprep.mubr.msk.bf16.mxu0 (!%p142_p9), %vm557_vm0, %v556_v1  ;;  %p166_p10 = scmp.lt.s32.totalorder (!%p142_p9), %s384_s28, 3  ;;  %v486_v4 = vld [vmem:[%s711_s1 + $0x18] sm:$0xff] (!%p142_p9)   ;;  %v487_v5 = vld [vmem:[%s711_s1 + $0x20] sm:$0xff] (!%p142_p9)   ;;  %v488_v6 = vld [vmem:[%s711_s1 + $0x28] sm:$0xff] (!%p142_p9)  }
   0xf   : > { %421 = vmatpush3.bf16.msra.mxu0 (!%p142_p9), %v483_v0  ;;  %v489_v7 = vld [vmem:[%s711_s1 + $0x30] sm:$0xff] (!%p142_p9)   ;;  %v490_v8 = vld [vmem:[%s711_s1 + $0x38] sm:$0xff] (!%p142_p9)   ;;  %s162_s27 = sand.u32 (!%p142_p9), 1, %s546_s13   ;;  %v386_v10 = vld [vmem:[%s712_s2] ss:$0 sm:$0xff] (!%p142_p9)  ;;  %s405_s6 = sshll.u32 (!%p142_p9), %s602_s16, 7 }
  0x10   : > { %422 = vmatprep.subr.bf16.mxu0 (!%p142_p9), %v556_v1  ;;  %s667_s9 = scalar_lea.hbm (!%p142_p9), %s713_s3, %s405_s6  ;;  %s669_s10 = scalar_lea.sflag (!%p142_p9), [#allocation3], %s162_s27 }
  0x11   : > { %s558_s16 = smov (!%p142_p9), [#allocation2]  }
  0x12   : > { %s496_s17 = sshll.u32 (!%p142_p9), %s558_s16, 4  ;;  %s497_s17 = int_to_ptr.vmem [resolvable:$false] %s496_s17 }
  0x13   : > { %423 = vmatpush3.bf16.msra.mxu0 (!%p142_p9), %v484_v2  ;;  %s498_s19 = scalar_lea.vmem (!%p142_p9), %s497_s17, 256 }
  0x14   : > { %424 = vmatprep.subr.bf16.mxu0 (!%p142_p9), %v556_v1 }
  0x15   : > { %s721_s28 = smov (!%p166_p10, %s384_s28), 3 }
  0x16   : > { %s385_s4 = sshll.u32 %s721_s28, 2  ;;  %s383_s28 = sshll.u32 %s162_s27, 3 }
  0x17   : > { %s169_s7 = scalar_lea.vmem %s710_s0, %s385_s4  ;;  %425 = vmatpush3.bf16.msra.mxu0 %v485_v3  ;;  %s164_s4 = scalar_lea.vmem [#allocation2], %s383_s28 }
  0x18   : > { %426 = vmatprep.subr.bf16.mxu0 %v556_v1  ;;  %v491_v9 = vld [vmem:[%s169_s7] sm:$0xff]   ;;  %s317_s5 = sshll.u32 %s164_s4, 4  ;;  %s662_s5 = int_to_ptr.vmem [resolvable:$true] %s317_s5 }
  0x19   : > { %s492_s11 = scalar_lea.vmem %s662_s5, 128  ;;  %p499_p0 = scmp.lt.s32.totalorder %s662_s5, %s497_s17 }
  0x1a   : > { %p493_p11 = scmp.ne.s32.totalorder %s662_s5, %s492_s11  ;;  %p500_p1 = scmp.lt.s32.totalorder %s498_s19, %s492_s11 }
  0x1b   : > { %427 = vmatpush3.bf16.msra.mxu0 %v486_v4 }
  0x1c   : > { %428 = vmatprep.subr.bf16.mxu0 %v556_v1  ;;  %p494_p12 = pnand %p493_p11, %p619_p5  ;;  %p501_p2 = por %p500_p1, %p499_p0 }
  0x1e   : > { %p495_p13 = pneg %p494_p12 }
  0x1f   : > { %429 = vmatpush3.bf16.msra.mxu0 %v487_v5 }
  0x20   : > { %430 = vmatprep.subr.bf16.mxu0 %v556_v1  ;;  %p502_p3 = pnand %p501_p2, %p495_p13 }
  0x23   : > { %431 = vmatpush3.bf16.msra.mxu0 %v488_v6 }
  0x24   : > { %432 = vmatprep.subr.bf16.mxu0 %v556_v1 }
  0x27   : > { %433 = vmatpush3.bf16.msra.mxu0 %v489_v7 }
  0x28   : > { %434 = vmatprep.subr.bf16.mxu0 %v556_v1 }
  0x2b   : > { %435 = vmatpush3.bf16.msra.mxu0 %v490_v8 }
  0x2e   : > { %437 = vmatmul.mubr.bf16.vlgmr.msra.gmra.mrb[0].mxu0 %v491_v9 }
 0x101   : > { %v286_v11 = vpop.f32.mrb[0].mxu0 }
 0x102   : > { %v438_v12 = vpop.f32.mrb[1].mxu0  ;;  %v287_v14 = vadd.f32 %v386_v10, %v286_v11 }
 0x103   : > { %v289_v13 = vpop.f32.mrb[2].mxu0 }
 0x104   : > { %v290_v15 = vadd.f32 %v386_v10, %v289_v13  ;;  %v439_v16 = vpop.f32.mrb[3].mxu0 }
 0x106   : > { %v409_v17 = vpack.c.bf16 %v290_v15, %v287_v14 }
 0x108   : > { %410 = vst [vmem:[%s164_s4] sm:$0xff] %v409_v17  }
 0x109   : > { %505 = shalt.err (!%p502_p3)
}
 0x10a   : > { %s506_s20 = scalar_lea.hbm %s667_s9, 128  ;;  %s510_s26 = scalar_lea.hbm %s713_s3, 256 }
 0x10b   : > { %p507_p4 = scmp.ne.s32.totalorder %s667_s9, %s506_s20  ;;  %p511_p9 = scmp.lt.u32.totalorder %s667_s9, %s713_s3 }
 0x10c   : > { %p512_p10 = scmp.lt.u32.totalorder %s510_s26, %s506_s20  ;;  %p514_p12 = scmp.lt.u32.totalorder %s506_s20, %s667_s9 }
 0x10d   : > { %p508_p7 = pnand %p507_p4, %p619_p5 }
 0x10e   : > { %p513_p11 = por %p512_p10, %p511_p9 }
 0x10f   : > { %p509_p8 = pneg %p508_p7 }
 0x110   : > { %p515_p13 = por %p514_p12, %p513_p11 }
 0x112   : > { %p516_p0 = pnand %p515_p13, %p509_p8 }
 0x114   : > { %519 = shalt.err (!%p516_p0)
}
 0x115   : > { %s559_s29 = smov 64   ;;  %s560_s30 = smov 4  }
 0x116   : > { %440 = dma.vmem_to_hbm [thread:$0]  (%p619_p5), %s662_s5, 128, %s667_s9, %s669_s10, %s559_s29, %s559_s29, %s560_s30  }
 0x117 PF: > { %p446_p1 = scmp.ge.s32.totalorder %s554_s15, 2  ;;  %s332_s4 = sand.u32 1, %s542_s12  }
 0x118   : > { %s333_s6 = scalar_lea.sflag [#allocation3], %s332_s4 }
 0x119   : > { %p443_p2 = pnand %p446_p1, %p623_p6 }
 0x11b   : > { %537 = dma.done.wait (!%p443_p2), %s333_s6, 128  }
 0x11c   : > { %539 = vsyncadd (!%p443_p2), %s333_s6, 4294967168  ;;  %p13_p3 = scmp.ge.s32.totalorder %s606_s18, 4   ;;  %s716_s12 = smov %s546_s13 }
 0x11d   : > { %s717_s13 = smov %s550_s14  ;;  %s718_s14 = smov %s617_s21 }
 0x11e   : > { %s719_s15 = smov %s606_s18  ;;  %15 = sbr.rel (!%p13_p3) target bundleno = 3 (0x3), region = 67 }
 0x125   :  { %338 = vsyncpa [#allocation3], 1 }
 0x126   :  { %340 = vsyncpa [#allocation3 + $0x1], 1 }

</bundles_post_ra>
